<compile_context>
chip_gen: v7x
topology: tpu7x:2x2x1
jax: 0.10.0
libtpu: 0.0.40
codegen_flags: <defaults>
</compile_context>

<pallas_src>
import jax
import jax.numpy as jnp
from jax.experimental import pallas as pl
from jax.experimental.pallas import tpu as pltpu


def _round_up(a, m):
    return ((a + m - 1) // m) * m


def _fused_glu_mlp_kernel(x_ref, w1o_ref, w1g_ref, b1o_ref, b1g_ref,
                          w2_ref, b2_ref, o_ref):
    """One row-tile of:  y = ((X@W1o + b1o) * sigmoid(X@W1g + b1g)) @ W2 + b2.

    GLU(dim=-1) semantics of torch.chunk(2, dim=2): first half of the hidden
    is the value path, second half is the gate. The split is realised at the
    weight level (W1 = [W1o | W1g]) so no lane-slicing of the activation is
    needed inside the kernel. x is read as f32 and cast to bf16 on the VPU
    (cast hidden under the MXU); all accumulation / bias / sigmoid in f32.
    """
    x = x_ref[...].astype(jnp.bfloat16)                               # (tile_n, dim)
    h_out = jnp.dot(x, w1o_ref[...],
                    preferred_element_type=jnp.float32) + b1o_ref[...]   # f32
    h_gate = jnp.dot(x, w1g_ref[...],
                     preferred_element_type=jnp.float32) + b1g_ref[...]  # f32
    a = h_out * jax.nn.sigmoid(h_gate)                                # (tile_n, 2*dim)
    y = jnp.dot(a.astype(w2_ref.dtype), w2_ref[...],
                preferred_element_type=jnp.float32) + b2_ref[...]        # f32
    o_ref[...] = y.astype(o_ref.dtype)


def prepare_patt_encode_params(params, lane=128):
    """One-time kernel-layout preparation of bh_out1 / bh_out2 parameters.

    Splits W1 into value/gate halves, casts matmul operands to bf16, and
    lane-pads W2/b2 to a multiple of 128 so output stores are lane-dense.
    Do this once (e.g. at load time), not per forward call.
    """
    w1, b1, w2, b2 = params["w1"], params["b1"], params["w2"], params["b2"]
    dim, hid = w1.shape
    half = hid // 2
    out_dim = w2.shape[1]
    out_pad = _round_up(out_dim, lane)
    return {
        "dim": dim,
        "half": half,
        "out_dim": out_dim,
        "out_pad": out_pad,
        "w1o": w1[:, :half].astype(jnp.bfloat16),        # value-path weights
        "w1g": w1[:, half:].astype(jnp.bfloat16),        # gate-path weights
        "b1o": b1[:half].reshape(1, half).astype(jnp.float32),
        "b1g": b1[half:].reshape(1, half).astype(jnp.float32),
        "w2p": jnp.pad(w2, ((0, 0), (0, out_pad - out_dim))).astype(jnp.bfloat16),
        "b2p": jnp.pad(b2, (0, out_pad - out_dim)).reshape(1, out_pad)
                  .astype(jnp.float32),
    }


def fused_glu_mlp(x2d, prep, *, tile_n=256, out_dtype=jnp.float32):
    """x2d: (N, dim) f32; prep: output of prepare_patt_encode_params.

    Returns (N, out_dim) in out_dtype. Rows are padded to a multiple of tile_n
    (tile_n adapts to small N) and the output feature dim is padded to a
    multiple of 128 (lane-dense stores); padding is stripped before returning.
    """
    N, dim = x2d.shape
    assert dim == prep["dim"]
    half = prep["half"]
    hid = 2 * half
    out_dim = prep["out_dim"]
    out_pad = prep["out_pad"]

    # --- adaptive row tile: keep >=2 grid steps when N allows it (megacore),
    #     and don't pad tiny N up to a huge tile -----------------------------
    tile_n = min(tile_n, max(8, _round_up(pl.cdiv(N, 2), 8)))
    n_pad = pl.cdiv(N, tile_n) * tile_n
    if n_pad != N:
        x2d = jnp.pad(x2d, ((0, n_pad - N), (0, 0)))
    grid = (n_pad // tile_n,)

    out_bytes = jnp.dtype(out_dtype).itemsize

    # --- VMEM budget: weights single-buffered once + double-buffered x/out
    #     tiles + f32 intermediates, with 1.5x slack --------------------------
    weight_bytes = (dim * hid + half * out_pad) * 2 + (hid + 2 * out_pad) * 4
    stream_bytes = 2 * tile_n * dim * 4 + 2 * tile_n * out_pad * out_bytes
    interm_bytes = tile_n * hid * 4 * 3 + tile_n * out_pad * 4
    vmem_limit = int(1.5 * (weight_bytes + stream_bytes + interm_bytes)) + (4 << 20)
    vmem_limit = max(16 << 20, min(vmem_limit, 64 << 20))

    cost = pl.CostEstimate(
        flops=2 * n_pad * dim * hid + 2 * n_pad * half * out_pad
              + 2 * n_pad * half + n_pad * (hid + out_pad),
        transcendentals=n_pad * half,                              # sigmoid
        bytes_accessed=(n_pad * dim * 4                            # x (f32, read once)
                        + dim * hid * 2 + half * out_pad * 2       # weights (bf16, once)
                        + (hid + out_pad) * 4                      # biases (f32)
                        + n_pad * out_pad * out_bytes),            # output
    )

    # Grid-invariant operands: single-buffered (DMA'd once, index_map constant).
    invariant = pl.Buffered(1)

    out_padded = pl.pallas_call(
        _fused_glu_mlp_kernel,
        out_shape=jax.ShapeDtypeStruct((n_pad, out_pad), out_dtype),
        grid_spec=pltpu.PrefetchScalarGridSpec(
            num_scalar_prefetch=0,
            grid=grid,
            in_specs=[
                pl.BlockSpec((tile_n, dim), lambda i: (i, 0)),       # x rows (f32)
                pl.BlockSpec((dim, half), lambda i: (0, 0),
                             pipeline_mode=invariant),               # W1 value half
                pl.BlockSpec((dim, half), lambda i: (0, 0),
                             pipeline_mode=invariant),               # W1 gate half
                pl.BlockSpec((1, half), lambda i: (0, 0),
                             pipeline_mode=invariant),               # b1 value half
                pl.BlockSpec((1, half), lambda i: (0, 0),
                             pipeline_mode=invariant),               # b1 gate half
                pl.BlockSpec((half, out_pad), lambda i: (0, 0),
                             pipeline_mode=invariant),               # W2 (lane-padded)
                pl.BlockSpec((1, out_pad), lambda i: (0, 0),
                             pipeline_mode=invariant),               # b2 (lane-padded)
            ],
            out_specs=pl.BlockSpec((tile_n, out_pad), lambda i: (i, 0)),
        ),
        compiler_params=pltpu.CompilerParams(
            dimension_semantics=("parallel",),                       # megacore rows
            vmem_limit_bytes=vmem_limit,
        ),
        cost_estimate=cost,
    )(x2d, prep["w1o"], prep["w1g"], prep["b1o"], prep["b1g"],
      prep["w2p"], prep["b2p"])

    return out_padded[:N, :out_dim]


def init_patt_encode_params(key, dim, out_dim, dtype=jnp.float32):
    """Deterministic init mimicking nn.Linear default (uniform +-1/sqrt(fan_in)).

    Weights are stored transposed relative to PyTorch ((in, out) instead of
    (out, in)) so the kernel can compute y = x @ W + b directly.
    """
    k1, k2, k3, k4 = jax.random.split(key, 4)
    bound1 = 1.0 / (dim ** 0.5)
    bound2 = 1.0 / ((2 * dim) ** 0.5)
    return {
        # bh_out1: Linear(dim, 4*dim)
        "w1": jax.random.uniform(k1, (dim, 4 * dim), dtype, -bound1, bound1),
        "b1": jax.random.uniform(k2, (4 * dim,), dtype, -bound1, bound1),
        # bh_out2: Linear(2*dim, out_dim)
        "w2": jax.random.uniform(k3, (2 * dim, out_dim), dtype, -bound2, bound2),
        "b2": jax.random.uniform(k4, (out_dim,), dtype, -bound2, bound2),
    }


def patt_encode_forward(x_img, y_bh, prep,
                        bh_attention_mask=None, img_attention_mask=None):
    """Forward of PATT_encode. Returns (img, bh_out) like the PyTorch module.

    `prep` is the one-time output of prepare_patt_encode_params(params).
    """
    # TODO(synk): sfa_img / sfa_bh / croa (Pself_attention, Pcoross_attention)
    # definitions were not supplied; applied as identity.
    img = x_img
    bh = y_bh

    B, S, D = bh.shape
    x2d = bh.reshape(B * S, D)
    out2d = fused_glu_mlp(x2d, prep)
    return img, out2d.reshape(B, S, prep["out_dim"])


def _reference_forward_f32(x_img, y_bh, params):
    """Plain-JAX f32 reference for the implemented path."""
    h = y_bh @ params["w1"] + params["b1"]
    half = h.shape[-1] // 2
    a = h[..., :half] * jax.nn.sigmoid(h[..., half:])
    return x_img, a @ params["w2"] + params["b2"]


def _reference_forward_bf16(x_img, y_bh, params):
    """Reference that mirrors the kernel's bf16 matmul-operand quantization."""
    q = lambda t: t.astype(jnp.bfloat16).astype(jnp.float32)
    x = q(y_bh)
    h = x @ q(params["w1"]) + params["b1"]
    half = h.shape[-1] // 2
    a = h[..., :half] * jax.nn.sigmoid(h[..., half:])
    return x_img, q(a) @ q(params["w2"]) + params["b2"]


if __name__ == "__main__":
    # Small shapes consistent with the module's forward:
    #   x_img: (B, S_img, dim), y_bh: (B, S_bh, dim)
    B, S_img, S_bh, dim, out_dim = 2, 8, 8, 32, 16

    key = jax.random.PRNGKey(0)
    k_img, k_bh, k_par = jax.random.split(key, 3)
    x_img = jax.random.normal(k_img, (B, S_img, dim), jnp.float32)
    y_bh = jax.random.normal(k_bh, (B, S_bh, dim), jnp.float32)
    params = init_patt_encode_params(k_par, dim, out_dim)
    prep = prepare_patt_encode_params(params)     # one-time weight layout prep

    img_out, bh_out = patt_encode_forward(x_img, y_bh, prep)
    img_out = jax.block_until_ready(img_out)
    bh_out = jax.block_until_ready(bh_out)

    # correctness checks
    _, ref_bh_q = _reference_forward_bf16(x_img, y_bh, params)   # bf16-quantized path
    _, ref_bh_f = _reference_forward_f32(x_img, y_bh, params)    # pure f32 path
    assert img_out.shape == (B, S_img, dim)
    assert bh_out.shape == (B, S_bh, out_dim)
    assert jnp.allclose(bh_out, ref_bh_q, atol=1e-3, rtol=1e-3)
    assert jnp.allclose(bh_out, ref_bh_f, atol=5e-2, rtol=5e-2)
    assert jnp.allclose(img_out, x_img)

    print("KERNEL_OK")
</pallas_src>

<mosaic_0001>
module attributes {stable_mosaic.version = 11 : i64} {
  func.func @_fused_glu_mlp_kernel(%arg0: i32, %arg1: memref<8x32xf32, #tpu.memory_space<vmem>>, %arg2: memref<32x64xbf16, #tpu.memory_space<vmem>>, %arg3: memref<32x64xbf16, #tpu.memory_space<vmem>>, %arg4: memref<1x64xf32, #tpu.memory_space<vmem>>, %arg5: memref<1x64xf32, #tpu.memory_space<vmem>>, %arg6: memref<64x128xbf16, #tpu.memory_space<vmem>>, %arg7: memref<1x128xf32, #tpu.memory_space<vmem>>, %arg8: memref<8x128xf32, #tpu.memory_space<vmem>>) attributes {dimension_semantics = [#tpu.dimension_semantics<parallel>], iteration_bounds = array<i64: 2>, scalar_prefetch = 0 : i64, scratch_operands = 0 : i64, tpu.core_type = #tpu.core_type<tc>, window_params = [{transform_indices = @transform_0, window_bounds = array<i64: 8, 32>}, {pipeline_mode = #tpu.pipeline_mode<synchronous>, transform_indices = @transform_1, window_bounds = array<i64: 32, 64>}, {pipeline_mode = #tpu.pipeline_mode<synchronous>, transform_indices = @transform_2, window_bounds = array<i64: 32, 64>}, {pipeline_mode = #tpu.pipeline_mode<synchronous>, transform_indices = @transform_3, window_bounds = array<i64: 1, 64>}, {pipeline_mode = #tpu.pipeline_mode<synchronous>, transform_indices = @transform_4, window_bounds = array<i64: 1, 64>}, {pipeline_mode = #tpu.pipeline_mode<synchronous>, transform_indices = @transform_5, window_bounds = array<i64: 64, 128>}, {pipeline_mode = #tpu.pipeline_mode<synchronous>, transform_indices = @transform_6, window_bounds = array<i64: 1, 128>}, {transform_indices = @transform_7, window_bounds = array<i64: 8, 128>}]} {
    %c0 = arith.constant 0 : index
    %c0_0 = arith.constant 0 : index
    %0 = vector.load %arg1[%c0, %c0_0] : memref<8x32xf32, #tpu.memory_space<vmem>>, vector<8x32xf32>
    %1 = arith.truncf %0 : vector<8x32xf32> to vector<8x32xbf16>
    %c0_1 = arith.constant 0 : index
    %c0_2 = arith.constant 0 : index
    %2 = vector.load %arg2[%c0_1, %c0_2] : memref<32x64xbf16, #tpu.memory_space<vmem>>, vector<32x64xbf16>
    %cst = arith.constant dense<0.000000e+00> : vector<8x64xf32>
    %3 = tpu.matmul %1, %2, %cst {dimension_numbers = #tpu.dot_dimension_numbers<[1], [0], [0], [1], [0, 0, 1, 1], [], []>} : vector<8x32xbf16>, vector<32x64xbf16>, vector<8x64xf32> -> vector<8x64xf32>
    %c0_3 = arith.constant 0 : index
    %c0_4 = arith.constant 0 : index
    %4 = vector.load %arg4[%c0_3, %c0_4] : memref<1x64xf32, #tpu.memory_space<vmem>>, vector<1x64xf32>
    %5 = vector.broadcast %4 : vector<1x64xf32> to vector<8x64xf32>
    %6 = arith.addf %3, %5 : vector<8x64xf32>
    %c0_5 = arith.constant 0 : index
    %c0_6 = arith.constant 0 : index
    %7 = vector.load %arg3[%c0_5, %c0_6] : memref<32x64xbf16, #tpu.memory_space<vmem>>, vector<32x64xbf16>
    %cst_7 = arith.constant dense<0.000000e+00> : vector<8x64xf32>
    %8 = tpu.matmul %1, %7, %cst_7 {dimension_numbers = #tpu.dot_dimension_numbers<[1], [0], [0], [1], [0, 0, 1, 1], [], []>} : vector<8x32xbf16>, vector<32x64xbf16>, vector<8x64xf32> -> vector<8x64xf32>
    %c0_8 = arith.constant 0 : index
    %c0_9 = arith.constant 0 : index
    %9 = vector.load %arg5[%c0_8, %c0_9] : memref<1x64xf32, #tpu.memory_space<vmem>>, vector<1x64xf32>
    %10 = vector.broadcast %9 : vector<1x64xf32> to vector<8x64xf32>
    %11 = arith.addf %8, %10 : vector<8x64xf32>
    %12 = arith.negf %11 : vector<8x64xf32>
    %13 = math.exp %12 : vector<8x64xf32>
    %cst_10 = arith.constant 1.000000e+00 : f32
    %14 = vector.broadcast %cst_10 : f32 to vector<8x64xf32>
    %15 = arith.addf %14, %13 : vector<8x64xf32>
    %16 = arith.divf %14, %15 : vector<8x64xf32>
    %17 = arith.mulf %6, %16 : vector<8x64xf32>
    %18 = arith.truncf %17 : vector<8x64xf32> to vector<8x64xbf16>
    %c0_11 = arith.constant 0 : index
    %c0_12 = arith.constant 0 : index
    %19 = vector.load %arg6[%c0_11, %c0_12] : memref<64x128xbf16, #tpu.memory_space<vmem>>, vector<64x128xbf16>
    %cst_13 = arith.constant dense<0.000000e+00> : vector<8x128xf32>
    %20 = tpu.matmul %18, %19, %cst_13 {dimension_numbers = #tpu.dot_dimension_numbers<[1], [0], [0], [1], [0, 0, 1, 1], [], []>} : vector<8x64xbf16>, vector<64x128xbf16>, vector<8x128xf32> -> vector<8x128xf32>
    %c0_14 = arith.constant 0 : index
    %c0_15 = arith.constant 0 : index
    %21 = vector.load %arg7[%c0_14, %c0_15] : memref<1x128xf32, #tpu.memory_space<vmem>>, vector<1x128xf32>
    %22 = vector.broadcast %21 : vector<1x128xf32> to vector<8x128xf32>
    %23 = arith.addf %20, %22 : vector<8x128xf32>
    %c0_16 = arith.constant 0 : index
    %c0_17 = arith.constant 0 : index
    %24 = vector.load %arg8[%c0_16, %c0_17] : memref<8x128xf32, #tpu.memory_space<vmem>>, vector<8x128xf32>
    tpu.vector_store %arg8[%c0_16, %c0_17], %23 {strides = array<i32>} : memref<8x128xf32, #tpu.memory_space<vmem>>, vector<8x128xf32>,
    return
  }
  func.func @transform_0(%arg0: i32) -> (i32, i32) {
    %c0_i32 = arith.constant 0 : i32
    %c0_i32_0 = arith.constant 0 : i32
    return %arg0, %c0_i32 : i32, i32
  }
  func.func @transform_1(%arg0: i32) -> (i32, i32) {
    %c0_i32 = arith.constant 0 : i32
    %c0_i32_0 = arith.constant 0 : i32
    %c0_i32_1 = arith.constant 0 : i32
    return %c0_i32, %c0_i32_0 : i32, i32
  }
  func.func @transform_2(%arg0: i32) -> (i32, i32) {
    %c0_i32 = arith.constant 0 : i32
    %c0_i32_0 = arith.constant 0 : i32
    %c0_i32_1 = arith.constant 0 : i32
    return %c0_i32, %c0_i32_0 : i32, i32
  }
  func.func @transform_3(%arg0: i32) -> (i32, i32) {
    %c0_i32 = arith.constant 0 : i32
    %c0_i32_0 = arith.constant 0 : i32
    %c0_i32_1 = arith.constant 0 : i32
    return %c0_i32, %c0_i32_0 : i32, i32
  }
  func.func @transform_4(%arg0: i32) -> (i32, i32) {
    %c0_i32 = arith.constant 0 : i32
    %c0_i32_0 = arith.constant 0 : i32
    %c0_i32_1 = arith.constant 0 : i32
    return %c0_i32, %c0_i32_0 : i32, i32
  }
  func.func @transform_5(%arg0: i32) -> (i32, i32) {
    %c0_i32 = arith.constant 0 : i32
    %c0_i32_0 = arith.constant 0 : i32
    %c0_i32_1 = arith.constant 0 : i32
    return %c0_i32, %c0_i32_0 : i32, i32
  }
  func.func @transform_6(%arg0: i32) -> (i32, i32) {
    %c0_i32 = arith.constant 0 : i32
    %c0_i32_0 = arith.constant 0 : i32
    %c0_i32_1 = arith.constant 0 : i32
    return %c0_i32, %c0_i32_0 : i32, i32
  }
  func.func @transform_7(%arg0: i32) -> (i32, i32) {
    %c0_i32 = arith.constant 0 : i32
    %c0_i32_0 = arith.constant 0 : i32
    return %arg0, %c0_i32 : i32, i32
  }
}

</mosaic_0001>

<bundles_post_ra>
// kernel: tpu_custom_call.1
= control target key start
LH: loop header
LB: loop body
LE: loop exit
PB: predicated region body
PF: predicated region fallthrough
CT: control target
= control target key end

     0   :  { %12 = vsyncpa [#allocation3], 0  ;;  %s1359_s0 = inlined_call_operand.hbm [shape: f32[16,32], index: 0, kind: input, shape index: {}]   ;;  %s1360_s1 = inlined_call_operand.hbm [shape: bf16[32,64], index: 1, kind: input, shape index: {}]   ;;  %s1361_s2 = inlined_call_operand.hbm [shape: bf16[32,64], index: 2, kind: input, shape index: {}]   ;;  %s1362_s3 = inlined_call_operand.vmem [shape: f32[1,64], index: 3, kind: input, shape index: {}]   ;;  %s1363_s4 = inlined_call_operand.vmem [shape: f32[1,64], index: 4, kind: input, shape index: {}]   ;;  %s1364_s5 = inlined_call_operand.hbm [shape: bf16[64,128], index: 5, kind: input, shape index: {}]   ;;  %s1365_s6 = inlined_call_operand.vmem [shape: f32[1,128], index: 6, kind: input, shape index: {}]   ;;  %s1366_s7 = inlined_call_operand.hbm [shape: f32[16,128], index: 7, kind: output, shape index: {}]  }
   0x1   :  { %14 = vsyncpa [#allocation3 + $0x1], 0 }
   0x2   :  { %15 = vsyncpa [#allocation6], 0 }
   0x3   :  { %16 = vsyncpa [#allocation9], 0 }
   0x4   :  { %17 = vsyncpa [#allocation4], 0 }
   0x5   :  { %19 = vsyncpa [#allocation4 + $0x1], 0  ;;  %s1080_s24 = smov 0   ;;  %s1082_s25 = smov 0  }
   0x6   :  { %s1084_s26 = smov 0   ;;  %s1086_s27 = smov 0  }
   0x7 LB: > { %s1101_s28 = sadd.s32 4294967295, %s1029_s27   ;;  %s676_s29 = sadd.s32 4294967294, %s1029_s27   ;;  %s1029_s27 = sphi %s1086_s27, %s1392_s27   ;;  %s1025_s26 = sphi %s1084_s26, %s1391_s26   ;;  %s1021_s25 = sphi %s1082_s25, %s1390_s25   ;;  %s1017_s24 = sphi %s1080_s24, %s1389_s24  }
   0x8   : > { %p45_p0 = scmp.ne.s32.totalorder %s1021_s25, %s1017_s24  ;;  %p1367_p1 = scmp.eq.s32.totalorder %s1101_s28, 0 }
   0x9   : > { %p201_p3 = scmp.eq.s32.totalorder %s676_s29, 1  ;;  %p677_p5 = scmp.ge.s32.totalorder %s1029_s27, 1 }
   0xa   : > { %p1110_p4 = por %p1367_p1, %p45_p0  ;;  %p208_p7 = scmp.lt.s32.totalorder %s1029_s27, 3 }
   0xb   : > { %p1115_p6 = por %p201_p3, %p45_p0  ;;  %s1031_s10 = smov [#allocation5]  }
   0xc   : > { %s1371_s30 = scalar_select %p1110_p4, 1, 0 }
   0xd   : > { %s1372_s8 = scalar_select %p1115_p6, 1, 0 }
   0xe   : > { %p1120_p8 = pnand %p677_p5, %p208_p7  ;;  %s220_s11 = sshll.u32 %s1031_s10, 4  ;;  %s1124_s11 = int_to_ptr.vmem [resolvable:$true] %s220_s11 }
   0xf   : > { %1373 = sst [smem:[#allocation15_spill]] %s1372_s8  ;;  %s1032_s13 = smov [#allocation7]  }
  0x10   : > { %s1374_s9 = scalar_select %p1120_p8, 1, 0 }
  0x11   : > { %p764_p9 = pneg %p1120_p8  ;;  %s233_s14 = sshll.u32 %s1032_s13, 4  ;;  %s1135_s14 = int_to_ptr.vmem [resolvable:$true] %s233_s14 }
  0x12   : > { %s1033_s15 = smov [#allocation8]   ;;  %s841_s19 = scalar_lea.hbm %s1360_s1, 256 }
  0x13   : > { %p1131_p11 = pnand %p764_p9, %p1367_p1  ;;  %s1137_s16 = sshll.u32 %s1033_s15, 4  ;;  %s253_s16 = int_to_ptr.vmem [resolvable:$true] %s1137_s16 }
  0x14   : > { %p842_p12 = scmp.ne.s32.totalorder %s1360_s1, %s841_s19  ;;  %p848_p5 = scmp.lt.u32.totalorder %s841_s19, %s1360_s1 }
  0x15   : > { %p1147_p13 = pneg %p1131_p11 }
  0x17   : > { %p844_p0 = pnand %p1147_p13, %p842_p12 }
  0x19   : > { %p845_p3 = pneg %p844_p0 }
  0x1b   : > { %p850_p7 = pnand %p848_p5, %p845_p3 }
  0x1d   : > { %853 = shalt.err (!%p850_p7)
}
  0x1e   : > { %s854_s10 = scalar_lea.vmem %s1124_s11, 256  ;;  %p862_p2 = scmp.lt.s32.totalorder %s1124_s11, %s1124_s11 }
  0x1f   : > { %p855_p9 = scmp.ne.s32.totalorder %s1124_s11, %s854_s10  ;;  %p863_p6 = scmp.lt.s32.totalorder %s854_s10, %s854_s10 }
  0x21   : > { %p857_p10 = pnand %p855_p9, %p1147_p13  ;;  %p864_p12 = por %p863_p6, %p862_p2 }
  0x23   : > { %p858_p1 = pneg %p857_p10 }
  0x25   : > { %p865_p0 = pnand %p864_p12, %p858_p1 }
  0x27   : > { %868 = shalt.err (!%p865_p0)
}
  0x28   : > { %s1034_s13 = smov 64   ;;  %s1035_s15 = smov 4  }
  0x29   : > { %767 = dma.hbm_to_vmem [thread:$0]  (!%p1131_p11), %s1360_s1, 256, %s1124_s11, [#allocation6], %s1034_s13, %s1034_s13, %s1035_s15  }
  0x2a   : > { %s869_s21 = scalar_lea.hbm %s1361_s2, 256 }
  0x2b   : > { %p870_p1 = scmp.ne.s32.totalorder %s1361_s2, %s869_s21  ;;  %p876_p10 = scmp.lt.u32.totalorder %s869_s21, %s1361_s2 }
  0x2d   : > { %p872_p2 = pnand %p870_p1, %p1147_p13 }
  0x2f   : > { %p873_p6 = pneg %p872_p2 }
  0x31   : > { %p878_p3 = pnand %p876_p10, %p873_p6 }
  0x33   : > { %881 = shalt.err (!%p878_p3)
}
  0x34   : > { %s882_s11 = scalar_lea.vmem %s1135_s14, 256  ;;  %p890_p12 = scmp.lt.s32.totalorder %s1135_s14, %s1135_s14 }
  0x35   : > { %p883_p5 = scmp.ne.s32.totalorder %s1135_s14, %s882_s11  ;;  %p891_p0 = scmp.lt.s32.totalorder %s882_s11, %s882_s11 }
  0x37   : > { %p885_p7 = pnand %p883_p5, %p1147_p13  ;;  %p892_p1 = por %p891_p0, %p890_p12 }
  0x39   : > { %p886_p9 = pneg %p885_p7 }
  0x3b   : > { %p893_p2 = pnand %p892_p1, %p886_p9 }
  0x3d   : > { %896 = shalt.err (!%p893_p2)
}
  0x3e   : > { %770 = dma.hbm_to_vmem [thread:$0]  (!%p1131_p11), %s1361_s2, 256, %s1135_s14, [#allocation6], %s1034_s13, %s1034_s13, %s1035_s15  }
  0x3f   : > { %s897_s20 = scalar_lea.hbm %s1364_s5, 512 }
  0x40   : > { %p898_p6 = scmp.ne.s32.totalorder %s1364_s5, %s897_s20  ;;  %p904_p5 = scmp.lt.u32.totalorder %s897_s20, %s1364_s5 }
  0x42   : > { %p900_p10 = pnand %p898_p6, %p1147_p13 }
  0x44   : > { %p901_p3 = pneg %p900_p10 }
  0x46   : > { %p906_p7 = pnand %p904_p5, %p901_p3 }
  0x48   : > { %909 = shalt.err (!%p906_p7)
}
  0x49   : > { %s910_s11 = scalar_lea.vmem %s253_s16, 512  ;;  %p918_p1 = scmp.lt.s32.totalorder %s253_s16, %s253_s16 }
  0x4a   : > { %p911_p9 = scmp.ne.s32.totalorder %s253_s16, %s910_s11  ;;  %p919_p2 = scmp.lt.s32.totalorder %s910_s11, %s910_s11 }
  0x4c   : > { %p913_p12 = pnand %p911_p9, %p1147_p13  ;;  %p920_p4 = por %p919_p2, %p918_p1 }
  0x4e   : > { %p914_p0 = pneg %p913_p12 }
  0x50   : > { %p921_p8 = pnand %p920_p4, %p914_p0 }
  0x52   : > { %924 = shalt.err (!%p921_p8)
}
  0x53   : > { %773 = dma.hbm_to_vmem [thread:$0]  (!%p1131_p11), %s1364_s5, 512, %s253_s16, [#allocation9], %s1034_s13, %s1034_s13, %s1035_s15  }
  0x54   : > { %s1220_s22 = sadd.s32 1, %s1029_s27   ;;  %s32_s17 = sadd.s32 1, %s1025_s26 }
  0x55   : > { %s29_s12 = ssub.s32 %s1029_s27, %s1220_s22  ;;  %p39_p8 = scmp.ne.s32.totalorder %s1025_s26, %s1021_s25 }
  0x56   : > { %p30_p4 = scmp.eq.s32.totalorder %s29_s12, 0  ;;  %p40_p13 = scmp.eq.s32.totalorder %s1029_s27, 0 }
  0x57   : > { %p785_p6 = scmp.lt.s32.totalorder %s1029_s27, 2  ;;  %p1377_p3 = scmp.eq.s32.totalorder %s1101_s28, 1 }
  0x58   : > { %s1230_s18 = scalar_select %p30_p4, %s1025_s26, %s32_s17  }
  0x59   : > { %p41_p10 = por %p40_p13, %p39_p8  ;;  %p1234_p5 = por %p1377_p3, %p39_p8 }
  0x5a   : > { %s269_s20 = sand.u32 1, %s1025_s26   ;;  %s683_s21 = sshll.u32 %s1029_s27, 7 }
  0x5b   : > { %s682_s16 = sshll.u32 %s269_s20, 3  ;;  %s1243_s23 = scalar_lea.hbm %s1359_s0, %s683_s21 }
  0x5c   : > { %s273_s29 = scalar_lea.vmem [#allocation2], %s682_s16  ;;  %p1245_p11 = pnand %p785_p6, %p41_p10 }
  0x5d   : > { %s280_s10 = sshll.u32 %s273_s29, 4  ;;  %s270_s14 = scalar_lea.sflag [#allocation3], %s269_s20  ;;  %s1249_s10 = int_to_ptr.vmem [resolvable:$true] %s280_s10 }
  0x5e   : > { %s925_s8 = scalar_lea.hbm %s1243_s23, 128  ;;  %p927_p9 = pneg %p1245_p11 }
  0x5f   : > { %p926_p7 = scmp.ne.s32.totalorder %s1243_s23, %s925_s8  ;;  %s930_s21 = scalar_lea.hbm %s1359_s0, 256 }
  0x60   : > { %p931_p1 = scmp.lt.u32.totalorder %s1243_s23, %s1359_s0  ;;  %p932_p2 = scmp.lt.u32.totalorder %s930_s21, %s925_s8 }
  0x61   : > { %p928_p12 = pnand %p927_p9, %p926_p7  ;;  %p934_p8 = scmp.lt.u32.totalorder %s925_s8, %s1243_s23 }
  0x62   : > { %p933_p4 = por %p932_p2, %p931_p1 }
  0x63   : > { %p929_p0 = pneg %p928_p12 }
  0x64   : > { %p935_p13 = por %p934_p8, %p933_p4 }
  0x66   : > { %p936_p6 = pnand %p935_p13, %p929_p0 }
  0x68   : > { %939 = shalt.err (!%p936_p6)
}
  0x69   : > { %s940_s20 = scalar_lea.vmem %s1249_s10, 128  ;;  %s1036_s15 = smov [#allocation2]  }
  0x6a   : > { %p941_p10 = scmp.ne.s32.totalorder %s1249_s10, %s940_s20  ;;  %s945_s29 = sshll.u32 %s1036_s15, 4  ;;  %s946_s29 = int_to_ptr.vmem [resolvable:$false] %s945_s29 }
  0x6b   : > { %s947_s12 = scalar_lea.vmem %s946_s29, 256  ;;  %p948_p12 = scmp.lt.s32.totalorder %s1249_s10, %s946_s29 }
  0x6c   : > { %p943_p3 = pnand %p941_p10, %p927_p9  ;;  %p949_p1 = scmp.lt.s32.totalorder %s947_s12, %s940_s20 }
  0x6e   : > { %p944_p7 = pneg %p943_p3  ;;  %p950_p2 = por %p949_p1, %p948_p12 }
  0x70   : > { %p951_p4 = pnand %p950_p2, %p944_p7 }
  0x72   : > { %954 = shalt.err (!%p951_p4)
}
  0x73   : > { %777 = dma.hbm_to_vmem [thread:$0]  (!%p1245_p11), %s1243_s23, 128, %s1249_s10, %s270_s14  }
  0x74   : > { %p1380_p0 = scmp.ne.s32.totalorder %s1374_s9, 0 }
  0x75   : > { %s1279_s8 = sand.u32 (!%p1380_p0), 1, %s1021_s25   ;;  %p1381_p9 = scmp.ne.s32.totalorder (!%p1380_p0), %s1371_s30, 0 }
  0x76   : > { %289 = sbr.rel (%p1380_p0) target bundleno = 623 (0x26f), region = 48  ;;  %s685_s17 = sshll.u32 (!%p1380_p0), %s1279_s8, 3 }
  0x77   : > { %s292_s21 = scalar_lea.sflag (!%p1380_p0), [#allocation3], %s1279_s8  ;;  %s295_s16 = scalar_lea.vmem (!%p1380_p0), [#allocation2], %s685_s17 }
  0x7d   : > { %1000 = dma.done.wait (%p1381_p9), %s292_s21, 128  }
  0x7e   : > { %1002 = vsyncadd (%p1381_p9), %s292_s21, 4294967168  ;;  %p1382_p11 = scmp.eq.s32.totalorder %s1101_s28, 0 }
  0x80   : > { %1004 = dma.done.wait (%p1382_p11), [#allocation6], 512   ;;  %p1383_p8 = pmov %p1382_p11 }
  0x82   : > { %1006 = vsyncadd (%p1383_p8), [#allocation6], 4294966784  ;;  %p1384_p13 = pmov %p1383_p8 }
  0x83   : > { %p1385_p6 = pmov %p1383_p8 }
  0x84   : > { %1008 = dma.done.wait (%p1384_p13), [#allocation9], 512  }
  0x85   : > { %1010 = vsyncadd (%p1385_p6), [#allocation9], 4294966784  ;;  %v1037_v0 = vmov 0.0   ;;  %vm1038_vm0 = vmmov 0   ;;  %v829_v1 = vld [vmem:[#allocation5] sm:$0xff]   ;;  %v830_v2 = vld [vmem:[#allocation5 + $0x8] sm:$0xff]  }
  0x86   : > { %720 = vmatprep.subr.bf16.mxu1 %v1037_v0  ;;  %724 = vmatprep.mubr.msk.bf16.mxu1 %vm1038_vm0, %v1037_v0  ;;  %v339_v3 = vld [vmem:[%s295_s16] sm:$0xff]  ;;  %vm364_vm1 = vcmask 261120   ;;  %v833_v7 = vld [vmem:[#allocation8] sm:$0xff]   ;;  %v834_v8 = vld [vmem:[#allocation8 + $0x8] sm:$0xff]   ;;  %vm518_vm2 = vcmask 523264   ;;  %s706_s13 = sshll.u32 %s1101_s28, 7 }
  0x87   : > { %736 = vmatprep.subr.bf16.mxu0 %v1037_v0  ;;  %744 = vmatprep.mubr.msk.bf16.mxu0 %vm1038_vm0, %v1037_v0  ;;  %v831_v4 = vld [vmem:[#allocation7] sm:$0xff]   ;;  %v340_v5 = vpack.c.bf16 %v339_v3, %v339_v3  ;;  %v832_v6 = vld [vmem:[#allocation7 + $0x8] sm:$0xff]   ;;  %s337_s20 = scalar_lea.vmem [#allocation10], %s685_s17  ;;  %s1315_s21 = scalar_lea.hbm %s1366_s7, %s706_s13 }
  0x88   : > { %721 = vmatpush3.bf16.msra.mxu1 %v829_v1  ;;  %737 = vmatpush3.bf16.msra.mxu0 %v833_v7  ;;  %v835_v9 = vld [vmem:[#allocation8 + $0x10] sm:$0xff]   ;;  %v836_v10 = vld [vmem:[#allocation8 + $0x18] sm:$0xff]   ;;  %s577_s15 = sshll.u32 %s337_s20, 4  ;;  %s564_s28 = scalar_lea.sflag [#allocation4], %s1279_s8  ;;  %s1317_s15 = int_to_ptr.vmem [resolvable:$true] %s577_s15 }
  0x89   : > { %722 = vmatprep.subr.bf16.mxu1 %v1037_v0  ;;  %738 = vmatprep.subr.bf16.mxu0 %v1037_v0  ;;  %v694_v15 = vld [vmem:[%s1363_s4] ss:$0 sm:$0xff]  ;;  %s955_s16 = scalar_lea.vmem %s1317_s15, 128  ;;  %s1039_s17 = smov [#allocation10]  }
  0x8a   : > { %v690_v24 = vld [vmem:[%s1362_s3] ss:$0 sm:$0xff]  ;;  %p956_p10 = scmp.ne.s32.totalorder %s1317_s15, %s955_s16  ;;  %s959_s30 = sshll.u32 %s1039_s17, 4  ;;  %s960_s30 = int_to_ptr.vmem [resolvable:$false] %s959_s30 }
  0x8b   : > { %v699_v29 = vld [vmem:[%s1365_s6] ss:$0 sm:$0xff]  ;;  %s961_s9 = scalar_lea.vmem %s960_s30, 256  ;;  %p962_p12 = scmp.lt.s32.totalorder %s1317_s15, %s960_s30 }
  0x8c   : > { %723 = vmatpush3.bf16.msra.mxu1 %v830_v2  ;;  %739 = vmatpush3.bf16.msra.mxu0 %v834_v8  ;;  %p957_p3 = pnand %p956_p10, %p1234_p5  ;;  %p963_p1 = scmp.lt.s32.totalorder %s961_s9, %s955_s16 }
  0x8d   : > { %728 = vmatprep.subr.bf16.mxu1 %v1037_v0  ;;  %740 = vmatprep.subr.bf16.mxu0 %v1037_v0 }
  0x8e   : > { %p958_p7 = pneg %p957_p3  ;;  %p964_p2 = por %p963_p1, %p962_p12 }
  0x8f   : > { %725 = vmatmul.mubr.msk.bf16.vlgmr.msra.gmra.mrb[0].mxu1 %vm364_vm1, %v340_v5 }
  0x90   : > { %729 = vmatpush3.bf16.msra.mxu1 %v831_v4  ;;  %732 = vmatprep.mubr.msk.bf16.mxu1 %vm1038_vm0, %v1037_v0  ;;  %p965_p4 = pnand %p964_p2, %p958_p7 }
  0x91   : > { %730 = vmatprep.subr.bf16.mxu1 %v1037_v0  ;;  %741 = vmatpush3.bf16.msra.mxu0 %v835_v9 }
  0x92   : > { %742 = vmatprep.subr.bf16.mxu0 %v1037_v0 }
  0x94   : > { %731 = vmatpush3.bf16.msra.mxu1 %v832_v6 }
  0x95   : > { %743 = vmatpush3.bf16.msra.mxu0 %v836_v10 }
  0x97   : > { %733 = vmatmul.mubr.msk.bf16.vlgmr.msra.gmra.mrb[4].mxu1 %vm364_vm1, %v340_v5 }
 0x162   : > { %v402_v11 = vpop.f32.mrb[0].mxu1 }
 0x163   : > { %v726_v12 = vpop.f32.mrb[1].mxu1  ;;  %v403_v25 = vadd.f32 %v690_v24, %v402_v11 }
 0x164   : > { %v405_v13 = vpop.f32.mrb[2].mxu1 }
 0x165   : > { %v727_v14 = vpop.f32.mrb[3].mxu1 }
 0x16a   : > { %v465_v16 = vpop.f32.mrb[4].mxu1 }
 0x16b   : > { %v466_v17 = vadd.f32 %v694_v15, %v465_v16  ;;  %v734_v18 = vpop.f32.mrb[5].mxu1 }
 0x16c   : > { %v468_v19 = vpop.f32.mrb[6].mxu1 }
 0x16d   : > { %v698_v20 = vmul.f32 -1.442695, %v466_v17  ;;  %v735_v21 = vpop.f32.mrb[7].mxu1 }
 0x16f   : > { %837 = vpow2.f32 %v698_v20 }
 0x179   : > { %v838_v22 = vpop.eup %837 }
 0x17a   : > { %v474_v23 = vadd.f32 1.0, %v838_v22 }
 0x17c   : > { %839 = vrcp.f32 %v474_v23 }
 0x186   : > { %v840_v26 = vpop.eup %839 }
 0x187   : > { %v477_v27 = vmul.f32 %v840_v26, %v403_v25 }
 0x189   : > { %v478_v28 = vpack.c.bf16 %v477_v27, %v477_v27 }
 0x18b   : > { %745 = vmatmul.mubr.msk.bf16.vlgmr.msra.gmra.mrb[0].mxu0 %vm518_vm2, %v478_v28 }
 0x25e   : > { %v556_v30 = vpop.f32.mrb[0].mxu0 }
 0x25f   : > { %v557_v31 = vadd.f32 %v699_v29, %v556_v30  ;;  %v746_v32 = vpop.f32.mrb[1].mxu0 }
 0x260   : > { %v559_v33 = vpop.f32.mrb[2].mxu0 }
 0x261   : > { %562 = vst [vmem:[%s337_s20] sm:$0xff] %v557_v31  ;;  %v747_v34 = vpop.f32.mrb[3].mxu0 }
 0x262   : > { %968 = shalt.err (!%p965_p4)
}
 0x263   : > { %s969_s8 = scalar_lea.hbm %s1315_s21, 128  ;;  %s973_s11 = scalar_lea.hbm %s1366_s7, 256 }
 0x264   : > { %p970_p0 = scmp.ne.s32.totalorder %s1315_s21, %s969_s8  ;;  %p974_p8 = scmp.lt.u32.totalorder %s1315_s21, %s1366_s7 }
 0x265   : > { %p975_p13 = scmp.lt.u32.totalorder %s973_s11, %s969_s8  ;;  %p977_p10 = scmp.lt.u32.totalorder %s969_s8, %s1315_s21 }
 0x266   : > { %p971_p9 = pnand %p970_p0, %p1234_p5 }
 0x267   : > { %p976_p6 = por %p975_p13, %p974_p8 }
 0x268   : > { %p972_p11 = pneg %p971_p9 }
 0x269   : > { %p978_p3 = por %p977_p10, %p976_p6 }
 0x26b   : > { %p979_p7 = pnand %p978_p3, %p972_p11 }
 0x26d   : > { %982 = shalt.err (!%p979_p7)
}
 0x26e   : > { %762 = dma.vmem_to_hbm [thread:$0]  (%p1234_p5), %s1317_s15, 128, %s1315_s21, %s564_s28  }
 0x26f PF: > { %s1386_s20 = sld [smem:[#allocation15_spill]]  ;;  %s589_s29 = sand.u32 1, %s1017_s24  }
 0x270   : > { %p1388_p1 = scmp.ge.s32.totalorder %s1029_s27, 2  ;;  %s590_s12 = scalar_lea.sflag [#allocation4], %s589_s29 }
 0x275   : > { %p1387_p12 = scmp.ne.s32.totalorder %s1386_s20, 0 }
 0x277   : > { %p779_p2 = pnand %p1388_p1, %p1387_p12 }
 0x279   : > { %1012 = dma.done.wait (!%p779_p2), %s590_s12, 128  }
 0x27a   : > { %1014 = vsyncadd (!%p779_p2), %s590_s12, 4294967168  ;;  %p22_p4 = scmp.ge.s32.totalorder %s1220_s22, 4   ;;  %s1389_s24 = smov %s1021_s25 }
 0x27b   : > { %s1390_s25 = smov %s1025_s26  ;;  %s1391_s26 = smov %s1230_s18 }
 0x27c   : > { %s1392_s27 = smov %s1220_s22  ;;  %24 = sbr.rel (!%p22_p4) target bundleno = 7 (0x7), region = 105 }
 0x283   :  { %595 = vsyncpa [#allocation3], 1 }
 0x284   :  { %597 = vsyncpa [#allocation3 + $0x1], 1 }
 0x285   :  { %598 = vsyncpa [#allocation6], 1 }
 0x286   :  { %599 = vsyncpa [#allocation9], 1 }
 0x287   :  { %600 = vsyncpa [#allocation4], 1 }
 0x288   :  { %602 = vsyncpa [#allocation4 + $0x1], 1 }

</bundles_post_ra>
